<compile_context>
chip_gen: v6e
topology: v6e:2x2x1
jax: 0.10.0
libtpu: 0.0.40
codegen_flags: <defaults>
</compile_context>

<pallas_src>
import functools

import jax
import jax.numpy as jnp
from jax.experimental import pallas as pl
from jax.experimental.pallas import tpu as pltpu


def _weighted_loss_kernel(pred_ref, targ_ref, w_ref, a0w_ref,
                          out_w_ref, out_a_ref, acc_ref, *,
                          b_tile, total_rows, blocks_per_slice,
                          needs_mask, loss_type):
    c = pl.program_id(0)          # parallel slice (TensorCore shard on v7x)
    i = pl.program_id(1)          # reduction step within the slice

    @pl.when(i == 0)
    def _init():
        acc_ref[...] = jnp.zeros_like(acc_ref)

    d = pred_ref[...].astype(jnp.float32) - targ_ref[...].astype(jnp.float32)
    if loss_type == "l2":
        e = d * d
    elif loss_type == "l1":
        e = jnp.abs(d)
    else:
        raise ValueError(f"unsupported loss_type: {loss_type}")

    if needs_mask:
        # Mask logically-out-of-range rows of the (possibly partial/duplicated)
        # last block. Pure VPU work; only emitted when actually needed.
        row0 = (c * blocks_per_slice + i) * b_tile
        rows = row0 + jax.lax.broadcasted_iota(jnp.int32, (b_tile, 1), 0)
        e = jnp.where(rows < total_rows, e, 0.0)

    acc_ref[...] += e             # elementwise accumulate, no per-step reduce

    @pl.when(i == pl.num_programs(1) - 1)
    def _finalize():
        acc = acc_ref[...]                           # (b_tile, W) f32
        w = w_ref[...].astype(jnp.float32)           # (1, W) weights[h, t]
        a0w = a0w_ref[...]                           # (1, W) masked 1/weights[0]
        out_w_ref[...] = jnp.reshape(jnp.sum(acc * w), (1, 1, 1))
        out_a_ref[...] = jnp.reshape(jnp.sum(acc * a0w), (1, 1, 1))


def weighted_loss(pred, targ, weights, action_dim, *,
                  loss_type="l2", target_block_bytes=4 * 1024 * 1024):
    """Pallas implementation of WeightedLoss.forward (L2 `_loss` by default).

    pred, targ : [B, H, T] arrays (any float dtype; bf16 inputs stay bf16 in HBM).
    weights    : [H, T]
    Returns (weighted_loss, {'a0_loss': a0_loss}) as device scalars.
    """
    assert pred.shape == targ.shape, "pred/targ shape mismatch"
    B, H, T = pred.shape
    assert weights.shape == (H, T), "weights must be [horizon, transition_dim]"
    A = int(action_dim)
    assert 0 < A <= T

    W = H * T
    pred2d = pred.reshape(B, W)       # free reshape of contiguous data
    targ2d = targ.reshape(B, W)

    w_flat = weights.reshape(1, W).astype(jnp.float32)
    inv_w0 = 1.0 / weights[0, :A].astype(jnp.float32)
    a0_coeff = jnp.zeros((1, W), jnp.float32).at[0, :A].set(inv_w0)

    # ---- choose a large row tile; lane dim is the full (lane-dense) W ----
    itemsize = pred.dtype.itemsize
    row_bytes = W * itemsize
    if B <= 8:
        b_tile = B
    else:
        est = max(1, target_block_bytes // row_bytes)
        b_tile = min(B, est)
        b_tile = max(8, (b_tile // 8) * 8)      # sublane-aligned
    # TODO(synk): add column tiling for extremely wide rows (H*T*4 >> 4 MiB).
    num_blocks = pl.cdiv(B, b_tile)

    # Leading "parallel" axis: 2-way shard of the row blocks for v7x megacore.
    n_par = 2 if num_blocks >= 2 else 1
    blocks_per_slice = pl.cdiv(num_blocks, n_par)
    exact = (n_par * blocks_per_slice == num_blocks)

    if exact:
        def in_map(c, i):
            return (c * blocks_per_slice + i, 0)
    else:
        def in_map(c, i):
            # Clamp duplicated trailing blocks; their rows are masked to zero.
            return (jnp.minimum(c * blocks_per_slice + i, num_blocks - 1), 0)

    needs_mask = (n_par * blocks_per_slice * b_tile) != B

    kernel = functools.partial(
        _weighted_loss_kernel,
        b_tile=b_tile, total_rows=B, blocks_per_slice=blocks_per_slice,
        needs_mask=needs_mask, loss_type=loss_type)

    cost = pl.CostEstimate(
        flops=5 * B * W, transcendentals=0,
        bytes_accessed=2 * B * W * itemsize + 2 * W * 4 + 2 * n_par * 4)

    out_w, out_a = pl.pallas_call(
        kernel,
        out_shape=(jax.ShapeDtypeStruct((n_par, 1, 1), jnp.float32),
                   jax.ShapeDtypeStruct((n_par, 1, 1), jnp.float32)),
        grid_spec=pltpu.PrefetchScalarGridSpec(
            num_scalar_prefetch=0,
            grid=(n_par, blocks_per_slice),
            in_specs=[
                pl.BlockSpec((b_tile, W), in_map),            # pred
                pl.BlockSpec((b_tile, W), in_map),            # targ
                pl.BlockSpec((1, W), lambda c, i: (0, 0)),    # weights (resident)
                pl.BlockSpec((1, W), lambda c, i: (0, 0)),    # a0 coeff (resident)
            ],
            out_specs=[
                pl.BlockSpec((1, 1, 1), lambda c, i: (c, 0, 0)),
                pl.BlockSpec((1, 1, 1), lambda c, i: (c, 0, 0)),
            ],
            scratch_shapes=[pltpu.VMEM((b_tile, W), jnp.float32)],
        ),
        compiler_params=pltpu.CompilerParams(
            dimension_semantics=("parallel", "arbitrary"),
            # ~5x block resident with the default 4 MiB target; 48 MiB is safe
            # on v5e/v6e (128 MiB physical) and v7x (64 MiB per TC).
            vmem_limit_bytes=48 * 1024 * 1024,
        ),
        cost_estimate=cost,
    )(pred2d, targ2d, w_flat, a0_coeff)

    weighted = jnp.sum(out_w) / jnp.float32(B * W)
    a0_loss = jnp.sum(out_a) / jnp.float32(B * A)
    return weighted, {"a0_loss": a0_loss}


class WeightedL2Loss:
    """Pallas analogue of WeightedLoss with the canonical L2 `_loss`."""

    def __init__(self, weights, action_dim):
        self.weights = jnp.asarray(weights)
        self.action_dim = int(action_dim)

    def __call__(self, pred, targ):
        return weighted_loss(pred, targ, self.weights, self.action_dim,
                             loss_type="l2")


if __name__ == "__main__":
    key = jax.random.PRNGKey(0)
    k1, k2, k3 = jax.random.split(key, 3)
    B, H, T, A = 2, 8, 32, 6          # batch x horizon x transition_dim
    pred = jax.random.normal(k1, (B, H, T), dtype=jnp.float32)
    targ = jax.random.normal(k2, (B, H, T), dtype=jnp.float32)
    weights = jax.random.uniform(k3, (H, T), dtype=jnp.float32,
                                 minval=0.5, maxval=1.5)

    loss_fn = WeightedL2Loss(weights, A)
    wl, info = loss_fn(pred, targ)
    wl = jax.block_until_ready(wl)
    a0 = jax.block_until_ready(info["a0_loss"])

    sq = (pred - targ) ** 2
    wl_ref = jnp.mean(sq * weights[None])
    a0_ref = jnp.mean(sq[:, 0, :A] / weights[0, :A])
    assert jnp.allclose(wl, wl_ref, rtol=1e-4, atol=1e-6), (wl, wl_ref)
    assert jnp.allclose(a0, a0_ref, rtol=1e-4, atol=1e-6), (a0, a0_ref)

    # Second small shape: exercises multi-block grid, the 2-slice parallel
    # axis, and the partial-block row mask (13 rows, 8-row tiles).
    k4, k5 = jax.random.split(k1)
    B2 = 13
    pred2 = jax.random.normal(k4, (B2, H, T), dtype=jnp.float32)
    targ2 = jax.random.normal(k5, (B2, H, T), dtype=jnp.float32)
    wl2, info2 = loss_fn(pred2, targ2)
    wl2 = jax.block_until_ready(wl2)
    sq2 = (pred2 - targ2) ** 2
    wl2_ref = jnp.mean(sq2 * weights[None])
    a02_ref = jnp.mean(sq2[:, 0, :A] / weights[0, :A])
    assert jnp.allclose(wl2, wl2_ref, rtol=1e-4, atol=1e-6), (wl2, wl2_ref)
    assert jnp.allclose(info2["a0_loss"], a02_ref, rtol=1e-4, atol=1e-6)

    print("KERNEL_OK")
</pallas_src>

<mosaic_0001>
module attributes {stable_mosaic.version = 11 : i64} {
  func.func @_weighted_loss_kernel(%arg0: i32, %arg1: i32, %arg2: memref<2x256xf32, #tpu.memory_space<vmem>>, %arg3: memref<2x256xf32, #tpu.memory_space<vmem>>, %arg4: memref<1x256xf32, #tpu.memory_space<vmem>>, %arg5: memref<1x256xf32, #tpu.memory_space<vmem>>, %arg6: memref<1x1x1xf32, #tpu.memory_space<vmem>>, %arg7: memref<1x1x1xf32, #tpu.memory_space<vmem>>, %arg8: memref<2x256xf32, #tpu.memory_space<vmem>>) attributes {dimension_semantics = [#tpu.dimension_semantics<parallel>, #tpu.dimension_semantics<arbitrary>], iteration_bounds = array<i64: 1, 1>, scalar_prefetch = 0 : i64, scratch_operands = 1 : i64, tpu.core_type = #tpu.core_type<tc>, window_params = [{transform_indices = @transform_0, window_bounds = array<i64: 2, 256>}, {transform_indices = @transform_1, window_bounds = array<i64: 2, 256>}, {pipeline_mode = #tpu.pipeline_mode<synchronous>, transform_indices = @transform_2, window_bounds = array<i64: 1, 256>}, {pipeline_mode = #tpu.pipeline_mode<synchronous>, transform_indices = @transform_3, window_bounds = array<i64: 1, 256>}, {transform_indices = @transform_4, window_bounds = array<i64: 1, 1, 1>}, {transform_indices = @transform_5, window_bounds = array<i64: 1, 1, 1>}]} {
    %c0_i32 = arith.constant 0 : i32
    %0 = arith.cmpi eq, %arg1, %c0_i32 : i32
    %1 = arith.extui %0 : i1 to i32
    %c0_i32_0 = arith.constant 0 : i32
    %2 = arith.cmpi ne, %1, %c0_i32_0 : i32
    scf.if %2 {
      %cst = arith.constant 0.000000e+00 : f32
      %13 = vector.broadcast %cst : f32 to vector<2x256xf32>
      %c0_10 = arith.constant 0 : index
      %c0_11 = arith.constant 0 : index
      %14 = vector.load %arg8[%c0_10, %c0_11] : memref<2x256xf32, #tpu.memory_space<vmem>>, vector<2x256xf32>
      tpu.vector_store %arg8[%c0_10, %c0_11], %13 {strides = array<i32>} : memref<2x256xf32, #tpu.memory_space<vmem>>, vector<2x256xf32>,
    } else {
    }
    %c0 = arith.constant 0 : index
    %c0_1 = arith.constant 0 : index
    %3 = vector.load %arg2[%c0, %c0_1] : memref<2x256xf32, #tpu.memory_space<vmem>>, vector<2x256xf32>
    %c0_2 = arith.constant 0 : index
    %c0_3 = arith.constant 0 : index
    %4 = vector.load %arg3[%c0_2, %c0_3] : memref<2x256xf32, #tpu.memory_space<vmem>>, vector<2x256xf32>
    %5 = arith.subf %3, %4 : vector<2x256xf32>
    %6 = arith.mulf %5, %5 : vector<2x256xf32>
    %c0_4 = arith.constant 0 : index
    %c0_5 = arith.constant 0 : index
    %7 = vector.load %arg8[%c0_4, %c0_5] : memref<2x256xf32, #tpu.memory_space<vmem>>, vector<2x256xf32>
    %8 = arith.addf %7, %6 : vector<2x256xf32>
    %c0_6 = arith.constant 0 : index
    %c0_7 = arith.constant 0 : index
    %9 = vector.load %arg8[%c0_6, %c0_7] : memref<2x256xf32, #tpu.memory_space<vmem>>, vector<2x256xf32>
    tpu.vector_store %arg8[%c0_6, %c0_7], %8 {strides = array<i32>} : memref<2x256xf32, #tpu.memory_space<vmem>>, vector<2x256xf32>,
    %c0_i32_8 = arith.constant 0 : i32
    %10 = arith.cmpi eq, %arg1, %c0_i32_8 : i32
    %11 = arith.extui %10 : i1 to i32
    %c0_i32_9 = arith.constant 0 : i32
    %12 = arith.cmpi ne, %11, %c0_i32_9 : i32
    scf.if %12 {
      %c0_10 = arith.constant 0 : index
      %c0_11 = arith.constant 0 : index
      %13 = vector.load %arg8[%c0_10, %c0_11] : memref<2x256xf32, #tpu.memory_space<vmem>>, vector<2x256xf32>
      %c0_12 = arith.constant 0 : index
      %c0_13 = arith.constant 0 : index
      %14 = vector.load %arg4[%c0_12, %c0_13] : memref<1x256xf32, #tpu.memory_space<vmem>>, vector<1x256xf32>
      %c0_14 = arith.constant 0 : index
      %c0_15 = arith.constant 0 : index
      %15 = vector.load %arg5[%c0_14, %c0_15] : memref<1x256xf32, #tpu.memory_space<vmem>>, vector<1x256xf32>
      %16 = vector.broadcast %14 : vector<1x256xf32> to vector<2x256xf32>
      %17 = arith.mulf %13, %16 : vector<2x256xf32>
      %18 = vector.shape_cast %17 : vector<2x256xf32> to vector<1x2x256xf32>
      %cst = arith.constant dense<0.000000e+00> : vector<1xf32>
      %19 = vector.multi_reduction <add>, %18, %cst [1, 2] : vector<1x2x256xf32> to vector<1xf32>
      %20 = vector.shape_cast %19 : vector<1xf32> to vector<1x1x1xf32>
      %21 = vector.extract %20[0, 0, 0] : f32 from vector<1x1x1xf32>
      %22 = vector.broadcast %21 : f32 to vector<1x1x1xf32>
      %c0_16 = arith.constant 0 : index
      %c0_17 = arith.constant 0 : index
      %c0_18 = arith.constant 0 : index
      %23 = vector.load %arg6[%c0_16, %c0_17, %c0_18] : memref<1x1x1xf32, #tpu.memory_space<vmem>>, vector<1x1x1xf32>
      tpu.vector_store %arg6[%c0_16, %c0_17, %c0_18], %22 {strides = array<i32>} : memref<1x1x1xf32, #tpu.memory_space<vmem>>, vector<1x1x1xf32>,
      %24 = vector.broadcast %15 : vector<1x256xf32> to vector<2x256xf32>
      %25 = arith.mulf %13, %24 : vector<2x256xf32>
      %26 = vector.shape_cast %25 : vector<2x256xf32> to vector<1x2x256xf32>
      %cst_19 = arith.constant dense<0.000000e+00> : vector<1xf32>
      %27 = vector.multi_reduction <add>, %26, %cst_19 [1, 2] : vector<1x2x256xf32> to vector<1xf32>
      %28 = vector.shape_cast %27 : vector<1xf32> to vector<1x1x1xf32>
      %29 = vector.extract %28[0, 0, 0] : f32 from vector<1x1x1xf32>
      %30 = vector.broadcast %29 : f32 to vector<1x1x1xf32>
      %c0_20 = arith.constant 0 : index
      %c0_21 = arith.constant 0 : index
      %c0_22 = arith.constant 0 : index
      %31 = vector.load %arg7[%c0_20, %c0_21, %c0_22] : memref<1x1x1xf32, #tpu.memory_space<vmem>>, vector<1x1x1xf32>
      tpu.vector_store %arg7[%c0_20, %c0_21, %c0_22], %30 {strides = array<i32>} : memref<1x1x1xf32, #tpu.memory_space<vmem>>, vector<1x1x1xf32>,
    } else {
    }
    return
  }
  func.func @transform_0(%arg0: i32, %arg1: i32) -> (i32, i32) {
    %c1_i32 = arith.constant 1 : i32
    %0 = arith.muli %arg0, %c1_i32 : i32
    %1 = arith.addi %0, %arg1 : i32
    %c0_i32 = arith.constant 0 : i32
    %c0_i32_0 = arith.constant 0 : i32
    return %1, %c0_i32 : i32, i32
  }
  func.func @transform_1(%arg0: i32, %arg1: i32) -> (i32, i32) {
    %c1_i32 = arith.constant 1 : i32
    %0 = arith.muli %arg0, %c1_i32 : i32
    %1 = arith.addi %0, %arg1 : i32
    %c0_i32 = arith.constant 0 : i32
    %c0_i32_0 = arith.constant 0 : i32
    return %1, %c0_i32 : i32, i32
  }
  func.func @transform_2(%arg0: i32, %arg1: i32) -> (i32, i32) {
    %c0_i32 = arith.constant 0 : i32
    %c0_i32_0 = arith.constant 0 : i32
    %c0_i32_1 = arith.constant 0 : i32
    return %c0_i32, %c0_i32_0 : i32, i32
  }
  func.func @transform_3(%arg0: i32, %arg1: i32) -> (i32, i32) {
    %c0_i32 = arith.constant 0 : i32
    %c0_i32_0 = arith.constant 0 : i32
    %c0_i32_1 = arith.constant 0 : i32
    return %c0_i32, %c0_i32_0 : i32, i32
  }
  func.func @transform_4(%arg0: i32, %arg1: i32) -> (i32, i32, i32) {
    %c0_i32 = arith.constant 0 : i32
    %c0_i32_0 = arith.constant 0 : i32
    %c0_i32_1 = arith.constant 0 : i32
    return %arg0, %c0_i32, %c0_i32_0 : i32, i32, i32
  }
  func.func @transform_5(%arg0: i32, %arg1: i32) -> (i32, i32, i32) {
    %c0_i32 = arith.constant 0 : i32
    %c0_i32_0 = arith.constant 0 : i32
    %c0_i32_1 = arith.constant 0 : i32
    return %arg0, %c0_i32, %c0_i32_0 : i32, i32, i32
  }
}

</mosaic_0001>

<bundles_post_ra>
// kernel: tpu_custom_call.1
= control target key start
LH: loop header
LB: loop body
LE: loop exit
PB: predicated region body
PF: predicated region fallthrough
CT: control target
= control target key end

     0   :  { %11 = vsyncpa [#allocation4], 0  ;;  %s347_s0 = inlined_call_operand.hbm [shape: f32[2,256], index: 0, kind: input, shape index: {}]   ;;  %s348_s1 = inlined_call_operand.hbm [shape: f32[2,256], index: 1, kind: input, shape index: {}]   ;;  %s349_s2 = inlined_call_operand.vmem [shape: f32[1,256], index: 2, kind: input, shape index: {}]   ;;  %s350_s3 = inlined_call_operand.vmem [shape: f32[1,256], index: 3, kind: input, shape index: {}]   ;;  %s351_s4 = inlined_call_operand.hbm [shape: f32[1,1,1], index: 4, kind: output, shape index: {0}]   ;;  %s352_s5 = inlined_call_operand.hbm [shape: f32[1,1,1], index: 5, kind: output, shape index: {1}]  }
   0x1   :  { %12 = vsyncpa [#allocation7], 0 }
   0x2   :  { %13 = vsyncpa [#allocation5], 0 }
   0x3   :  { %14 = vsyncpa [#allocation10], 0  ;;  %s291_s18 = smov [#allocation3]   ;;  %s292_s20 = smov [#allocation6]  }
   0x4   :  { %s25_s19 = sshll.u32 %s291_s18, 4  ;;  %s39_s21 = sshll.u32 %s292_s20, 4  ;;  %s26_s19 = int_to_ptr.vmem [resolvable:$true] %s25_s19  ;;  %s40_s21 = int_to_ptr.vmem [resolvable:$true] %s39_s21 }
   0x5   :  { %s211_s22 = scalar_lea.vmem %s26_s19, 64  ;;  %p216_p1 = scmp.lt.s32.totalorder %s26_s19, %s26_s19 }
   0x6   :  { %p212_p0 = scmp.ne.s32.totalorder %s26_s19, %s211_s22  ;;  %p217_p2 = scmp.lt.s32.totalorder %s211_s22, %s211_s22 }
   0x8   :  { %p218_p3 = por %p217_p2, %p216_p1 }
   0xa   :  { %p219_p4 = pnand %p218_p3, %p212_p0 }
   0xc   :  { %222 = shalt.err (!%p219_p4)
}
   0xd   :  { %28 = dma.hbm_to_vmem [thread:$0]  %s347_s0, 64, %s26_s19, [#allocation4]  }
   0xe   :  { %s231_s25 = scalar_lea.vmem %s40_s21, 64  ;;  %p236_p6 = scmp.lt.s32.totalorder %s40_s21, %s40_s21 }
   0xf   :  { %p232_p5 = scmp.ne.s32.totalorder %s40_s21, %s231_s25  ;;  %p237_p7 = scmp.lt.s32.totalorder %s231_s25, %s231_s25 }
  0x11   :  { %p238_p8 = por %p237_p7, %p236_p6 }
  0x13   :  { %p239_p9 = pnand %p238_p8, %p232_p5 }
  0x15   :  { %242 = shalt.err (!%p239_p9)
}
  0x16   :  { %42 = dma.hbm_to_vmem [thread:$0]  %s348_s1, 64, %s40_s21, [#allocation7]  }
  0x17   :  { %283 = dma.done.wait [#allocation4], 64  }
  0x18   :  { %284 = vsyncadd [#allocation4], 4294967232 }
  0x19   :  { %285 = dma.done.wait [#allocation7], 64  }
  0x1a   :  { %286 = vsyncadd [#allocation7], 4294967232  ;;  %v74_v0 = vlaneseq  ;;  %v293_v1 = vmov 0.0   ;;  %v294_v4 = vmov 1983009808   ;;  %vm103_vm0 = vcmask 1041408  }
  0x1b   :  { %59 = vst [vmem:[#allocation2] sm:$0xf] %v293_v1  ;;  %v84_v5 = vunpack.c.l.s4 %v294_v4  ;;  %v60_v7 = vld [vmem:[#allocation3] sm:$0xf]  ;;  %v61_v8 = vld [vmem:[#allocation6] sm:$0xf] }
  0x1c   :  { %v75_v2 = vshrl.u32 %v74_v0, 7  ;;  %v71_v9 = vld [vmem:[%s349_s2] sm:$0x3]  ;;  %v62_v10 = vsub.f32 %v60_v7, %v61_v8  ;;  %s295_s2 = smov [#allocation8]   ;;  %vm117_vm1 = vcmask 0   ;;  %s296_s6 = smov [#allocation9]  }
  0x1d   :  { %v72_v11 = vld [vmem:[%s350_s3] sm:$0x3]  ;;  %v85_v14 = vunpack.c.0.s8 %v84_v5  ;;  %s169_s3 = sshll.u32 %s295_s2, 4  ;;  %s179_s7 = sshll.u32 %s296_s6, 4  ;;  %s170_s3 = int_to_ptr.vmem [resolvable:$true] %s169_s3  ;;  %s180_s7 = int_to_ptr.vmem [resolvable:$true] %s179_s7 }
  0x1e   :  { %v76_v3 = vsub.s32 0, %v75_v2  ;;  %v80_v6 = vsub.s32 1, %v75_v2  ;;  %v63_v15 = vmul.f32 %v62_v10, %v62_v10  ;;  %s243_s8 = scalar_lea.vmem %s170_s3, 16  ;;  %s247_s9 = scalar_lea.vmem %s170_s3, 32 }
  0x1f   :  { %v88_v21 = vsub.s32 %v85_v14, %v75_v2  ;;  %p244_p10 = scmp.ne.s32.totalorder %s170_s3, %s243_s8  ;;  %p248_p11 = scmp.lt.s32.totalorder %s170_s3, %s170_s3 }
  0x20   :  { %v77_v13 = vrot.slane %v71_v9, %v76_v3  ;;  %v81_v16 = vrot.slane %v71_v9, %v80_v6  ;;  %v123_v17 = vrot.slane %v72_v11, %v76_v3  ;;  %v127_v18 = vrot.slane %v72_v11, %v80_v6  ;;  %p249_p12 = scmp.lt.s32.totalorder %s247_s9, %s243_s8 }
  0x22   :  { %v64_v12 = vld [vmem:[#allocation2] sm:$0xf]  ;;  %v82_v20 = vcombine.low %v77_v13, %v81_v16  ;;  %v128_v22 = vcombine.low %v123_v17, %v127_v18  ;;  %p250_p13 = por %p249_p12, %p248_p11 }
  0x23   :  { %v65_v19 = vadd.f32 %v64_v12, %v63_v15 }
  0x24   :  { %v89_v23 = vrot.slane %v82_v20, %v88_v21  ;;  %v135_v24 = vrot.slane %v128_v22, %v88_v21  ;;  %p251_p0 = pnand %p250_p13, %p244_p10 }
  0x25   :  { %66 = vst [vmem:[#allocation2] sm:$0xf] %v65_v19 }
  0x2c   :  { %v70_v25 = vld [vmem:[#allocation2] sm:$0xf] }
  0x2d   :  { %v91_v26 = vmul.f32 %v89_v23, %v70_v25  ;;  %v137_v27 = vmul.f32 %v135_v24, %v70_v25 }
  0x2f   :  { %v99_v28 = vrot.slane %v91_v26, %v88_v21  ;;  %v145_v29 = vrot.slane %v137_v27, %v88_v21 }
  0x31   :  { %v100_v30 = vcombine.high %v99_v28, %v99_v28  ;;  %v104_v31 = vsel %vm103_vm0, %v99_v28, 0.0  ;;  %v146_v32 = vcombine.high %v145_v29, %v145_v29  ;;  %v149_v34 = vsel %vm103_vm0, %v145_v29, 0.0 }
  0x33   :  { %v105_v33 = vsel %vm103_vm0, %v100_v30, 0.0  ;;  %v150_v35 = vsel %vm103_vm0, %v146_v32, 0.0 }
  0x34   :  { %v106_v36 = vadd.f32 %v105_v33, %v104_v31  ;;  %v151_v37 = vadd.f32 %v150_v35, %v149_v34 }
  0x36   :  { %107 = vadd.xlane.f32.xlu0 %v106_v36 }
  0x3a   :  { %152 = vadd.xlane.f32.xlu0 %v151_v37 }
  0xbf   :  { %v108_v38 = vpop.xlane.xlu0 %107 }
  0xc0   :  { %v109_v39 = vrot.slane %v108_v38, 4 }
  0xc2   :  { %v110_v40 = vadd.f32 %v109_v39, %v108_v38 }
  0xc3   :  { %v153_v41 = vpop.xlane.xlu0 %152 }
  0xc4   :  { %v111_v42 = vrot.slane %v110_v40, 2  ;;  %v154_v43 = vrot.slane %v153_v41, 4 }
  0xc6   :  { %v155_v44 = vadd.f32 %v154_v43, %v153_v41  ;;  %v112_v45 = vadd.f32 %v111_v42, %v110_v40 }
  0xc8   :  { %v156_v46 = vrot.slane %v155_v44, 2  ;;  %v113_v47 = vrot.slane %v112_v45, 1 }
  0xca   :  { %v157_v48 = vadd.f32 %v156_v46, %v155_v44  ;;  %v114_v49 = vadd.f32 %v113_v47, %v112_v45 }
  0xcc   :  { %193 = vpush %v114_v49  ;;  %v158_v50 = vrot.slane %v157_v48, 1 }
  0xce   :  { %v159_v51 = vadd.f32 %v158_v50, %v157_v48 }
  0xd0   :  { %195 = vpush %v159_v51 }
  0xfd   :  { %s194_s30 = spop %193 }
  0xfe   :  { %v116_v52 = vstv %s194_s30 }
  0xff   :  { %118 = vst.msk [vmem:[#allocation8] sm:$0x1] %vm117_vm1, %v116_v52 }
 0x100   :  { %254 = shalt.err (!%p251_p0)
}
 0x101   :  { %172 = dma.vmem_to_hbm [thread:$0]  %s170_s3, 16, %s351_s4, [#allocation5]  }
 0x102   :  { %s196_s12 = spop %195  ;;  %s263_s13 = scalar_lea.vmem %s180_s7, 16 }
 0x103   :  { %v161_v53 = vstv %s196_s12  ;;  %p264_p1 = scmp.ne.s32.totalorder %s180_s7, %s263_s13  ;;  %s267_s14 = scalar_lea.vmem %s180_s7, 32 }
 0x104   :  { %162 = vst.msk [vmem:[#allocation9] sm:$0x1] %vm117_vm1, %v161_v53  ;;  %p268_p2 = scmp.lt.s32.totalorder %s180_s7, %s180_s7  ;;  %p269_p3 = scmp.lt.s32.totalorder %s267_s14, %s263_s13 }
 0x106   :  { %p270_p4 = por %p269_p3, %p268_p2 }
 0x108   :  { %p271_p5 = pnand %p270_p4, %p264_p1 }
 0x10a   :  { %274 = shalt.err (!%p271_p5)
}
 0x10b   :  { %182 = dma.vmem_to_hbm [thread:$0]  %s180_s7, 16, %s352_s5, [#allocation10]  }
 0x10c   :  { %287 = dma.done.wait [#allocation5], 16  }
 0x10d   :  { %288 = vsyncadd [#allocation5], 4294967280 }
 0x10e   :  { %289 = dma.done.wait [#allocation10], 16  }
 0x10f   :  { %290 = vsyncadd [#allocation10], 4294967280 }
 0x110   :  { %189 = vsyncpa [#allocation4], 1 }
 0x111   :  { %190 = vsyncpa [#allocation7], 1 }
 0x112   :  { %191 = vsyncpa [#allocation5], 1 }
 0x113   :  { %192 = vsyncpa [#allocation10], 1 }

</bundles_post_ra>
